<compile_context>
chip_gen: v7x
topology: tpu7x:2x2x1
jax: 0.10.0
libtpu: 0.0.40
codegen_flags: <defaults>
</compile_context>

<pallas_src>
import math
from typing import NamedTuple, Optional

import jax
import jax.numpy as jnp
from jax.experimental import pallas as pl
from jax.experimental.pallas import tpu as pltpu


def _round_up(x, m):
    return ((x + m - 1) // m) * m


def _vmem_budget_bytes():
    """~75% of per-TensorCore VMEM; conservative 48 MiB fallback (fits v7x)."""
    cap = 64 * 1024 * 1024
    try:
        cap = int(pltpu.get_tpu_info().vmem_capacity_bytes)
    except Exception:
        pass
    return (cap * 3) // 4


def _sublane_multiple(dtype):
    # f32 -> 8, bf16 -> 16, int8/fp8 -> 32 (sub-32-bit packs along sublanes)
    return max(8, 32 // jnp.dtype(dtype).itemsize)


def _tile_vmem_bytes(tm, tn, tk, in_itemsize, out_itemsize, use_scratch):
    b = 2 * (tm * tk + tk * tn) * in_itemsize      # double-buffered inputs
    b += 2 * tm * tn * out_itemsize                # output block
    if use_scratch:
        b += tm * tn * 4                           # f32 accumulator scratch
    return b + (2 << 20)                           # bias tile + Mosaic headroom


# ---------------------------------------------------------------------------
# Kernels.  Grid = (M//tm, N//tn, K//tk), K innermost ("arbitrary").
# f32-output kernels accumulate directly into o_ref (resident across k).
# ---------------------------------------------------------------------------
def _kernel_f32out_bias(x_ref, w_ref, b_ref, o_ref):
    k = pl.program_id(2)

    @pl.when(k == 0)
    def _init():
        o_ref[...] = jnp.broadcast_to(b_ref[...], o_ref.shape)

    o_ref[...] += jnp.dot(x_ref[...], w_ref[...],
                          preferred_element_type=jnp.float32)


def _kernel_f32out(x_ref, w_ref, o_ref):
    k = pl.program_id(2)

    @pl.when(k == 0)
    def _init():
        o_ref[...] = jnp.zeros_like(o_ref)

    o_ref[...] += jnp.dot(x_ref[...], w_ref[...],
                          preferred_element_type=jnp.float32)


def _kernel_acc_bias(x_ref, w_ref, b_ref, o_ref, acc_ref):
    k = pl.program_id(2)

    @pl.when(k == 0)
    def _init():
        acc_ref[...] = jnp.broadcast_to(b_ref[...], acc_ref.shape)

    acc_ref[...] += jnp.dot(x_ref[...], w_ref[...],
                            preferred_element_type=jnp.float32)

    @pl.when(k == pl.num_programs(2) - 1)
    def _finalize():
        o_ref[...] = acc_ref[...].astype(o_ref.dtype)


def _kernel_acc(x_ref, w_ref, o_ref, acc_ref):
    k = pl.program_id(2)

    @pl.when(k == 0)
    def _init():
        acc_ref[...] = jnp.zeros_like(acc_ref)

    acc_ref[...] += jnp.dot(x_ref[...], w_ref[...],
                            preferred_element_type=jnp.float32)

    @pl.when(k == pl.num_programs(2) - 1)
    def _finalize():
        o_ref[...] = acc_ref[...].astype(o_ref.dtype)


# ---------------------------------------------------------------------------
# Parameter preparation (one-time: transpose + pad + optional bf16 cast).
# ---------------------------------------------------------------------------
class LinearParams(NamedTuple):
    w_kn: jax.Array               # (K_pad, N_pad), pre-transposed, pre-padded
    bias: Optional[jax.Array]     # (1, N_pad) float32, or None
    out_features: int
    in_features: int
    tn: int
    tk: int
    compute_dtype: jnp.dtype


def prepare_linear(weight, bias=None, *, compute_dtype=None,
                   tn_max=1024, tk_max=1024):
    """weight: (out_features, in_features), bias: (out_features,) or None."""
    N, K = weight.shape
    cdt = jnp.dtype(compute_dtype) if compute_dtype is not None else jnp.dtype(weight.dtype)
    in_it = cdt.itemsize
    budget = _vmem_budget_bytes()

    # Lane-dense tiles (multiples of 128; multiples of 256 when N allows,
    # matching the v6e/v7x MXU pass width), shrunk to fit the VMEM budget
    # assuming a 512-row x tile.
    tn = min(tn_max, _round_up(N, 128))
    tk = min(tk_max, _round_up(K, 128))
    while (_tile_vmem_bytes(512, tn, tk, in_it, 4, True) > budget
           and (tn > 128 or tk > 128)):
        if tk >= tn and tk > 128:
            tk = max(128, tk // 2)
        else:
            tn = max(128, tn // 2)

    K_pad, N_pad = _round_up(K, tk), _round_up(N, tn)
    w_kn = weight.T                           # (K, N): canonical MXU feed
    if (K_pad, N_pad) != (K, N):
        w_kn = jnp.pad(w_kn, ((0, K_pad - K), (0, N_pad - N)))
    w_kn = w_kn.astype(cdt)

    b2d = None
    if bias is not None:
        b2d = bias.reshape(1, N).astype(jnp.float32)
        if N_pad != N:
            b2d = jnp.pad(b2d, ((0, 0), (0, N_pad - N)))

    return LinearParams(w_kn, b2d, N, K, tn, tk, cdt)


# ---------------------------------------------------------------------------
# Forward pass.
# ---------------------------------------------------------------------------
def linear_pallas(x, params: LinearParams, *, tm_max=512):
    """Equivalent of torch.nn.functional.linear(x, weight, bias)."""
    *lead, K = x.shape
    assert K == params.in_features, "last dim of x must equal in_features"
    N = params.out_features
    out_dtype = x.dtype

    M = int(math.prod(lead)) if lead else 1
    if M == 0:
        return jnp.zeros((*lead, N), dtype=out_dtype)

    cdt = params.compute_dtype
    x2d = x.reshape(M, K).astype(cdt)

    tn, tk = params.tn, params.tk
    K_pad, N_pad = params.w_kn.shape
    in_it = jnp.dtype(cdt).itemsize
    out_it = jnp.dtype(out_dtype).itemsize
    use_scratch = out_dtype != jnp.float32     # f32 out -> accumulate in o_ref

    budget = _vmem_budget_bytes()
    sub_m = _sublane_multiple(cdt)
    if in_it <= 2:
        tm_max = max(tm_max, 1024)             # bf16: bigger tiles, same bytes
    tm = min(tm_max, _round_up(M, sub_m))
    while (_tile_vmem_bytes(tm, tn, tk, in_it, out_it, use_scratch) > budget
           and tm > sub_m):
        tm = max(sub_m, tm // 2)

    M_pad = _round_up(M, tm)
    # Keep >=2 output tiles when possible so both v7x TensorCores get work.
    if M_pad // tm == 1 and N_pad // tn == 1 and tm >= 2 * sub_m and M > sub_m:
        tm = _round_up(max(sub_m, tm // 2), sub_m)
        M_pad = _round_up(M, tm)

    if (M_pad, K_pad) != (M, K):
        x2d = jnp.pad(x2d, ((0, M_pad - M), (0, K_pad - K)))

    grid = (M_pad // tm, N_pad // tn, K_pad // tk)

    x_spec = pl.BlockSpec((tm, tk), lambda i, j, k: (i, k))
    w_spec = pl.BlockSpec((tk, tn), lambda i, j, k: (k, j))
    o_spec = pl.BlockSpec((tm, tn), lambda i, j, k: (i, j))

    # bytes_accessed accounts for the (N_pad/tn)x re-read of x and
    # (M_pad/tm)x re-read of W.
    cost = pl.CostEstimate(
        flops=2 * M_pad * N_pad * K_pad,
        transcendentals=0,
        bytes_accessed=(M_pad * K_pad * in_it * (N_pad // tn)
                        + K_pad * N_pad * in_it * (M_pad // tm)
                        + M_pad * N_pad * out_it),
    )
    compiler_params = pltpu.CompilerParams(
        dimension_semantics=("parallel", "parallel", "arbitrary"),
        vmem_limit_bytes=int(budget),
    )

    if params.bias is not None:
        in_specs = [x_spec, w_spec, pl.BlockSpec((1, tn), lambda i, j, k: (0, j))]
        operands = (x2d, params.w_kn, params.bias)
        kernel = _kernel_acc_bias if use_scratch else _kernel_f32out_bias
    else:
        in_specs = [x_spec, w_spec]
        operands = (x2d, params.w_kn)
        kernel = _kernel_acc if use_scratch else _kernel_f32out

    scratch = [pltpu.VMEM((tm, tn), jnp.float32)] if use_scratch else []

    out2d = pl.pallas_call(
        kernel,
        out_shape=jax.ShapeDtypeStruct((M_pad, N_pad), out_dtype),
        grid_spec=pltpu.PrefetchScalarGridSpec(
            num_scalar_prefetch=0,
            grid=grid,
            in_specs=in_specs,
            out_specs=o_spec,
            scratch_shapes=scratch,
        ),
        compiler_params=compiler_params,
        cost_estimate=cost,
    )(*operands)

    out2d = out2d[:M, :N]
    return out2d.reshape(*lead, N)


def linear(x, weight, bias=None, *, compute_dtype=None):
    """Convenience one-shot wrapper (prep every call). For repeated calls,
    use prepare_linear() once and linear_pallas(x, params)."""
    return linear_pallas(x, prepare_linear(weight, bias, compute_dtype=compute_dtype))


def init_linear_params(key, in_features, out_features, bias=True, dtype=jnp.float32):
    """Mirrors Linear.reset_parameters(): kaiming_uniform_(a=sqrt(5)) on the
    weight and uniform(+-1/sqrt(fan_in)) on the bias (both reduce to the same
    +-1/sqrt(fan_in) bound)."""
    kw, kb = jax.random.split(key)
    bound = 1.0 / math.sqrt(in_features)
    weight = jax.random.uniform(kw, (out_features, in_features),
                                minval=-bound, maxval=bound, dtype=dtype)
    b = None
    if bias:
        b = jax.random.uniform(kb, (out_features,),
                               minval=-bound, maxval=bound, dtype=dtype)
    return weight, b


if __name__ == "__main__":
    key = jax.random.PRNGKey(0)
    k1, k2, k3, k4, k5, k6 = jax.random.split(key, 6)

    # Case 1: transformer-like shape with bias, f32 (accumulate-into-output path).
    batch, seq, in_features, out_features = 2, 8, 32, 64
    x = jax.random.normal(k1, (batch, seq, in_features), dtype=jnp.float32)
    weight, bias = init_linear_params(k2, in_features, out_features, bias=True)
    params = prepare_linear(weight, bias)
    y = jax.block_until_ready(linear_pallas(x, params))
    y_ref = jnp.einsum("bsk,nk->bsn", x, weight) + bias
    assert y.shape == (batch, seq, out_features)
    assert jnp.allclose(y, y_ref, atol=1e-5, rtol=1e-5)

    # Case 2: unaligned shapes (padding + slicing), no bias.
    M2, K2, N2 = 17, 96, 200
    x2 = jax.random.normal(k3, (M2, K2), dtype=jnp.float32)
    w2, _ = init_linear_params(k4, K2, N2, bias=False)
    y2 = jax.block_until_ready(linear_pallas(x2, prepare_linear(w2)))
    assert y2.shape == (M2, N2)
    assert jnp.allclose(y2, x2 @ w2.T, atol=1e-5, rtol=1e-5)

    # Case 3: multi-step K reduction (tk_max forces 3 k-steps) + bf16 compute
    # operands with f32 accumulation / f32 output.
    M3, K3, N3 = 64, 384, 256
    x3 = jax.random.normal(k5, (M3, K3), dtype=jnp.float32)
    w3, b3 = init_linear_params(k6, K3, N3, bias=True)
    p3 = prepare_linear(w3, b3, compute_dtype=jnp.bfloat16, tk_max=128)
    y3 = jax.block_until_ready(linear_pallas(x3, p3))
    y3_ref = x3 @ w3.T + b3
    assert y3.shape == (M3, N3)
    assert jnp.allclose(y3, y3_ref, atol=3e-2, rtol=3e-2)

    print("KERNEL_OK")
</pallas_src>

<mosaic_0001>
module attributes {stable_mosaic.version = 11 : i64} {
  func.func @_kernel_f32out_bias(%arg0: i32, %arg1: i32, %arg2: i32, %arg3: memref<8x128xf32, #tpu.memory_space<vmem>>, %arg4: memref<128x128xf32, #tpu.memory_space<vmem>>, %arg5: memref<1x128xf32, #tpu.memory_space<vmem>>, %arg6: memref<8x128xf32, #tpu.memory_space<vmem>>) attributes {dimension_semantics = [#tpu.dimension_semantics<parallel>, #tpu.dimension_semantics<parallel>, #tpu.dimension_semantics<arbitrary>], iteration_bounds = array<i64: 2, 1, 1>, scalar_prefetch = 0 : i64, scratch_operands = 0 : i64, tpu.core_type = #tpu.core_type<tc>, window_params = [{transform_indices = @transform_0, window_bounds = array<i64: 8, 128>}, {transform_indices = @transform_1, window_bounds = array<i64: 128, 128>}, {transform_indices = @transform_2, window_bounds = array<i64: 1, 128>}, {transform_indices = @transform_3, window_bounds = array<i64: 8, 128>}]} {
    %c0_i32 = arith.constant 0 : i32
    %0 = arith.cmpi eq, %arg2, %c0_i32 : i32
    %1 = arith.extui %0 : i1 to i32
    %c0_i32_0 = arith.constant 0 : i32
    %2 = arith.cmpi ne, %1, %c0_i32_0 : i32
    scf.if %2 {
      %c0_8 = arith.constant 0 : index
      %c0_9 = arith.constant 0 : index
      %9 = vector.load %arg5[%c0_8, %c0_9] : memref<1x128xf32, #tpu.memory_space<vmem>>, vector<1x128xf32>
      %10 = vector.shape_cast %9 : vector<1x128xf32> to vector<1x128xf32>
      %11 = vector.broadcast %10 : vector<1x128xf32> to vector<8x128xf32>
      %c0_10 = arith.constant 0 : index
      %c0_11 = arith.constant 0 : index
      %12 = vector.load %arg6[%c0_10, %c0_11] : memref<8x128xf32, #tpu.memory_space<vmem>>, vector<8x128xf32>
      tpu.vector_store %arg6[%c0_10, %c0_11], %11 {strides = array<i32>} : memref<8x128xf32, #tpu.memory_space<vmem>>, vector<8x128xf32>,
    } else {
    }
    %c0 = arith.constant 0 : index
    %c0_1 = arith.constant 0 : index
    %3 = vector.load %arg6[%c0, %c0_1] : memref<8x128xf32, #tpu.memory_space<vmem>>, vector<8x128xf32>
    %c0_2 = arith.constant 0 : index
    %c0_3 = arith.constant 0 : index
    %4 = vector.load %arg3[%c0_2, %c0_3] : memref<8x128xf32, #tpu.memory_space<vmem>>, vector<8x128xf32>
    %c0_4 = arith.constant 0 : index
    %c0_5 = arith.constant 0 : index
    %5 = vector.load %arg4[%c0_4, %c0_5] : memref<128x128xf32, #tpu.memory_space<vmem>>, vector<128x128xf32>
    %cst = arith.constant dense<0.000000e+00> : vector<8x128xf32>
    %6 = tpu.matmul %4, %5, %cst {dimension_numbers = #tpu.dot_dimension_numbers<[1], [0], [0], [1], [0, 0, 1, 1], [], []>} : vector<8x128xf32>, vector<128x128xf32>, vector<8x128xf32> -> vector<8x128xf32>
    %7 = arith.addf %3, %6 : vector<8x128xf32>
    %c0_6 = arith.constant 0 : index
    %c0_7 = arith.constant 0 : index
    %8 = vector.load %arg6[%c0_6, %c0_7] : memref<8x128xf32, #tpu.memory_space<vmem>>, vector<8x128xf32>
    tpu.vector_store %arg6[%c0_6, %c0_7], %7 {strides = array<i32>} : memref<8x128xf32, #tpu.memory_space<vmem>>, vector<8x128xf32>,
    return
  }
  func.func @transform_0(%arg0: i32, %arg1: i32, %arg2: i32) -> (i32, i32) {
    %c0_i32 = arith.constant 0 : i32
    return %arg0, %arg2 : i32, i32
  }
  func.func @transform_1(%arg0: i32, %arg1: i32, %arg2: i32) -> (i32, i32) {
    %c0_i32 = arith.constant 0 : i32
    return %arg2, %arg1 : i32, i32
  }
  func.func @transform_2(%arg0: i32, %arg1: i32, %arg2: i32) -> (i32, i32) {
    %c0_i32 = arith.constant 0 : i32
    %c0_i32_0 = arith.constant 0 : i32
    return %c0_i32, %arg1 : i32, i32
  }
  func.func @transform_3(%arg0: i32, %arg1: i32, %arg2: i32) -> (i32, i32) {
    %c0_i32 = arith.constant 0 : i32
    return %arg0, %arg1 : i32, i32
  }
}

</mosaic_0001>

<bundles_post_ra>
// kernel: tpu_custom_call.1
= control target key start
LH: loop header
LB: loop body
LE: loop exit
PB: predicated region body
PF: predicated region fallthrough
CT: control target
= control target key end

     0   :  { %8 = vsyncpa [#allocation3], 0  ;;  %s1046_s0 = inlined_call_operand.hbm [shape: f32[16,128], index: 0, kind: input, shape index: {}]   ;;  %s1047_s1 = inlined_call_operand.hbm [shape: f32[128,128], index: 1, kind: input, shape index: {}]   ;;  %s1048_s2 = inlined_call_operand.vmem [shape: f32[1,128], index: 2, kind: input, shape index: {}]   ;;  %s1049_s3 = inlined_call_operand.hbm [shape: f32[16,128], index: 3, kind: output, shape index: {}]  }
   0x1   :  { %10 = vsyncpa [#allocation3 + $0x1], 0 }
   0x2   :  { %11 = vsyncpa [#allocation6], 0 }
   0x3   :  { %12 = vsyncpa [#allocation4], 0 }
   0x4   :  { %14 = vsyncpa [#allocation4 + $0x1], 0  ;;  %s822_s12 = smov 0   ;;  %s824_s13 = smov 0  }
   0x5   :  { %s826_s14 = smov 0   ;;  %s828_s15 = smov 0  }
   0x6   :  { %s830_s16 = smov 0   ;;  %s832_s17 = smov 0  }
   0x7 LB: > { %s477_s18 = sadd.s32 4294967295, %s792_s17   ;;  %s478_s19 = sadd.s32 4294967294, %s792_s17   ;;  %s792_s17 = sphi %s832_s17, %s20_s17   ;;  %s788_s16 = sphi %s830_s16, %s1073_s16   ;;  %s784_s15 = sphi %s828_s15, %s1072_s15   ;;  %s780_s14 = sphi %s826_s14, %s1071_s14   ;;  %s776_s13 = sphi %s824_s13, %s1070_s13   ;;  %s772_s12 = sphi %s822_s12, %s1069_s12  }
   0x8   : > { %p61_p0 = scmp.ne.s32.totalorder %s776_s13, %s772_s12  ;;  %p856_p1 = scmp.eq.s32.totalorder %s477_s18, 0 }
   0x9   : > { %p860_p2 = scmp.eq.s32.totalorder %s477_s18, 1  ;;  %p147_p3 = scmp.eq.s32.totalorder %s478_s19, 1 }
   0xa   : > { %s1054_s20 = scalar_select %p856_p1, 1, 0 }
   0xb   : > { %s1055_s21 = scalar_select %p860_p2, 1, 0 }
   0xc   : > { %p866_p4 = por %p856_p1, %p61_p0  ;;  %p479_p5 = scmp.ge.s32.totalorder %s792_s17, 1 }
   0xd   : > { %p871_p6 = por %p147_p3, %p61_p0  ;;  %p154_p7 = scmp.lt.s32.totalorder %s792_s17, 3 }
   0xe   : > { %s1056_s22 = scalar_select %p866_p4, 1, 0 }
   0xf   : > { %s1057_s23 = scalar_select %p871_p6, 1, 0 }
  0x10   : > { %p876_p8 = pnand %p479_p5, %p154_p7  ;;  %s794_s25 = smov [#allocation5]  }
  0x11   : > { %s170_s26 = sshll.u32 %s794_s25, 4  ;;  %s39_s28 = sadd.s32 1, %s788_s16  ;;  %s171_s26 = int_to_ptr.vmem [resolvable:$true] %s170_s26 }
  0x12   : > { %s1058_s24 = scalar_select %p876_p8, 1, 0 }
  0x13   : > { %p578_p9 = pneg %p876_p8  ;;  %s648_s4 = scalar_lea.hbm %s1047_s1, 2048 }
  0x14   : > { %p649_p12 = scmp.ne.s32.totalorder %s1047_s1, %s648_s4  ;;  %p655_p5 = scmp.lt.u32.totalorder %s648_s4, %s1047_s1 }
  0x15   : > { %p885_p11 = pnand %p578_p9, %p856_p1 }
  0x17   : > { %p650_p13 = pneg %p885_p11 }
  0x19   : > { %p651_p0 = pnand %p650_p13, %p649_p12 }
  0x1b   : > { %p652_p3 = pneg %p651_p0 }
  0x1d   : > { %p657_p7 = pnand %p655_p5, %p652_p3 }
  0x1f   : > { %660 = shalt.err (!%p657_p7)
}
  0x20   : > { %s661_s9 = scalar_lea.vmem %s171_s26, 2048  ;;  %p669_p1 = scmp.lt.s32.totalorder %s171_s26, %s171_s26 }
  0x21   : > { %p662_p9 = scmp.ne.s32.totalorder %s171_s26, %s661_s9  ;;  %p670_p4 = scmp.lt.s32.totalorder %s661_s9, %s661_s9 }
  0x23   : > { %p664_p10 = pnand %p662_p9, %p650_p13  ;;  %p671_p8 = por %p670_p4, %p669_p1 }
  0x25   : > { %p665_p6 = pneg %p664_p10 }
  0x27   : > { %p672_p2 = pnand %p671_p8, %p665_p6 }
  0x29   : > { %675 = shalt.err (!%p672_p2)
}
  0x2a   : > { %s795_s10 = smov 128   ;;  %s796_s11 = smov 8  }
  0x2b   : > { %581 = dma.hbm_to_vmem [thread:$0]  (!%p885_p11), %s1047_s1, 2048, %s171_s26, [#allocation6], %s795_s10, %s795_s10, %s796_s11  }
  0x2c   : > { %p41_p1 = scmp.ge.s32.totalorder %s39_s28, 2  ;;  %s48_s25 = sadd.s32 1, %s780_s14 }
  0x2d   : > { %p55_p2 = scmp.ne.s32.totalorder %s780_s14, %s776_s13  ;;  %p56_p4 = scmp.eq.s32.totalorder %s792_s17, 0 }
  0x2e   : > { %s1075_s28 = smov (%p41_p1, %s39_s28), 0  ;;  %p1061_p8 = scmp.ne.s32.totalorder %s1055_s21, 0 }
  0x2f   : > { %p912_p6 = por %p56_p4, %p55_p2  ;;  %s43_s27 = ssub.s32 %s788_s16, %s1075_s28 }
  0x30   : > { %p918_p10 = por %p1061_p8, %p55_p2  ;;  %p591_p12 = scmp.lt.s32.totalorder %s792_s17, 2 }
  0x31   : > { %p46_p11 = scmp.eq.s32.totalorder %s43_s27, 0  ;;  %s190_s26 = sand.u32 1, %s780_s14  }
  0x32   : > { %s483_s4 = sshll.u32 %s190_s26, 3  ;;  %s484_s6 = sshll.u32 %s788_s16, 7 }
  0x33   : > { %s927_s5 = scalar_select %p46_p11, %s780_s14, %s48_s25  }
  0x34   : > { %s933_s9 = scalar_lea.hbm %s1046_s0, %s484_s6  ;;  %s194_s21 = scalar_lea.vmem [#allocation2], %s483_s4 }
  0x35   : > { %s202_s10 = sshll.u32 %s194_s21, 4  ;;  %p939_p13 = pnand %p591_p12, %p912_p6  ;;  %s935_s10 = int_to_ptr.vmem [resolvable:$true] %s202_s10 }
  0x36   : > { %s191_s18 = scalar_lea.sflag [#allocation3], %s190_s26  ;;  %s676_s19 = scalar_lea.hbm %s933_s9, 128 }
  0x37   : > { %p677_p0 = scmp.ne.s32.totalorder %s933_s9, %s676_s19  ;;  %p678_p3 = pneg %p939_p13 }
  0x38   : > { %s681_s4 = scalar_lea.hbm %s1046_s0, 256  ;;  %p682_p9 = scmp.lt.u32.totalorder %s933_s9, %s1046_s0 }
  0x39   : > { %p679_p5 = pnand %p678_p3, %p677_p0  ;;  %p683_p1 = scmp.lt.u32.totalorder %s681_s4, %s676_s19 }
  0x3a   : > { %p685_p4 = scmp.lt.u32.totalorder %s676_s19, %s933_s9 }
  0x3b   : > { %p680_p7 = pneg %p679_p5  ;;  %p684_p2 = por %p683_p1, %p682_p9 }
  0x3d   : > { %p686_p6 = por %p685_p4, %p684_p2 }
  0x3f   : > { %p687_p8 = pnand %p686_p6, %p680_p7 }
  0x41   : > { %690 = shalt.err (!%p687_p8)
}
  0x42   : > { %s691_s26 = scalar_lea.vmem %s935_s10, 128  ;;  %s797_s7 = smov [#allocation2]  }
  0x43   : > { %p692_p12 = scmp.ne.s32.totalorder %s935_s10, %s691_s26  ;;  %s696_s8 = sshll.u32 %s797_s7, 4  ;;  %s697_s8 = int_to_ptr.vmem [resolvable:$false] %s696_s8 }
  0x44   : > { %s698_s21 = scalar_lea.vmem %s697_s8, 256  ;;  %p699_p5 = scmp.lt.s32.totalorder %s935_s10, %s697_s8 }
  0x45   : > { %p694_p11 = pnand %p692_p12, %p678_p3  ;;  %p700_p9 = scmp.lt.s32.totalorder %s698_s21, %s691_s26 }
  0x47   : > { %p695_p0 = pneg %p694_p11  ;;  %p701_p1 = por %p700_p9, %p699_p5 }
  0x49   : > { %p702_p2 = pnand %p701_p1, %p695_p0 }
  0x4b   : > { %705 = shalt.err (!%p702_p2)
}
  0x4c   : > { %585 = dma.hbm_to_vmem [thread:$0]  (!%p939_p13), %s933_s9, 128, %s935_s10, %s191_s18  }
  0x4d   : > { %p1064_p7 = scmp.ne.s32.totalorder %s1058_s24, 0 }
  0x4e   : > { %s971_s19 = sand.u32 (!%p1064_p7), 1, %s776_s13   ;;  %p1065_p3 = scmp.ne.s32.totalorder (!%p1064_p7), %s1056_s22, 0 }
  0x4f   : > { %211 = sbr.rel (%p1064_p7) target bundleno = 353 (0x161), region = 32  ;;  %s486_s25 = sshll.u32 (!%p1064_p7), %s971_s19, 3 }
  0x50   : > { %s214_s27 = scalar_lea.sflag (!%p1064_p7), [#allocation3], %s971_s19  ;;  %s977_s4 = scalar_lea.vmem (!%p1064_p7), [#allocation2], %s486_s25 }
  0x56   : > { %759 = dma.done.wait (%p1065_p3), %s214_s27, 128  }
  0x57   : > { %761 = vsyncadd (%p1065_p3), %s214_s27, 4294967168  ;;  %p1066_p13 = scmp.ne.s32.totalorder %s1054_s20, 0 }
  0x59   : > { %763 = dma.done.wait (%p1066_p13), [#allocation6], 2048  }
  0x5a   : > { %765 = vsyncadd (%p1066_p13), [#allocation6], 4294965248  ;;  %v798_v0 = vmov 0.0|0.0   ;;  %vm799_vm0 = vmmov 0   ;;  %v800_v1 = vmov 0.0   ;;  %v265_v2 = vld [vmem:[#allocation5] sm:$0xff] }
  0x5b   : > { %546 = vmatprep.subr.bf16.mxu0 %v798_v0  ;;  %543 = vmatprep.mubr.msk.f32.mxu0 %vm799_vm0, %v800_v1  ;;  %v266_v3 = vld [vmem:[#allocation5 + $0x8] sm:$0xff]  ;;  %v267_v4 = vld [vmem:[#allocation5 + $0x10] sm:$0xff]  ;;  %v268_v6 = vld [vmem:[#allocation5 + $0x18] sm:$0xff]  ;;  %s491_s24 = sshll.u32 %s784_s15, 7  ;;  %s246_s9 = scalar_lea.vmem [#allocation7], %s486_s25 }
  0x5c   : > { %v547_v5 = vpack.c.bf16 %v266_v3, %v265_v2  ;;  %v550_v7 = vpack.c.bf16 %v268_v6, %v267_v4  ;;  %v269_v8 = vld [vmem:[#allocation5 + $0x20] sm:$0xff]  ;;  %v270_v9 = vld [vmem:[#allocation5 + $0x28] sm:$0xff]  ;;  %v271_v11 = vld [vmem:[#allocation5 + $0x30] sm:$0xff]  ;;  %s368_s10 = sshll.u32 %s246_s9, 4  ;;  %s997_s29 = scalar_lea.hbm %s1049_s3, %s491_s24  ;;  %s999_s10 = int_to_ptr.vmem [resolvable:$true] %s368_s10 }
  0x5d   : > { %v553_v10 = vpack.c.bf16 %v270_v9, %v269_v8  ;;  %v272_v12 = vld [vmem:[#allocation5 + $0x38] sm:$0xff]  ;;  %v273_v14 = vld [vmem:[#allocation5 + $0x40] sm:$0xff]  ;;  %v274_v15 = vld [vmem:[#allocation5 + $0x48] sm:$0xff]  ;;  %s354_s6 = scalar_lea.sflag [#allocation4], %s971_s19  ;;  %s706_s26 = scalar_lea.vmem %s999_s10, 128 }
  0x5e   : > { %548 = vmatpush3.bf16.msra.mxu0 %v547_v5  ;;  %v556_v13 = vpack.c.bf16 %v272_v12, %v271_v11  ;;  %v559_v16 = vpack.c.bf16 %v274_v15, %v273_v14  ;;  %v275_v17 = vld [vmem:[#allocation5 + $0x50] sm:$0xff]  ;;  %v276_v18 = vld [vmem:[#allocation5 + $0x58] sm:$0xff]  ;;  %v277_v20 = vld [vmem:[#allocation5 + $0x60] sm:$0xff]  ;;  %p707_p4 = scmp.ne.s32.totalorder %s999_s10, %s706_s26  ;;  %s801_s15 = smov [#allocation7]  }
  0x5f   : > { %549 = vmatprep.subr.bf16.mxu0 %v798_v0  ;;  %v562_v19 = vpack.c.bf16 %v276_v18, %v275_v17  ;;  %v278_v21 = vld [vmem:[#allocation5 + $0x68] sm:$0xff]  ;;  %v279_v23 = vld [vmem:[#allocation5 + $0x70] sm:$0xff]  ;;  %v280_v24 = vld [vmem:[#allocation5 + $0x78] sm:$0xff]  ;;  %s710_s7 = sshll.u32 %s801_s15, 4  ;;  %s711_s7 = int_to_ptr.vmem [resolvable:$false] %s710_s7 }
  0x60   : > { %v565_v22 = vpack.c.bf16 %v278_v21, %v277_v20  ;;  %v568_v25 = vpack.c.bf16 %v280_v24, %v279_v23  ;;  %v264_v26 = vld [vmem:[%s977_s4] sm:$0xff]  ;;  %p708_p6 = pnand %p707_p4, %p918_p10  ;;  %s712_s8 = scalar_lea.vmem %s711_s7, 256 }
  0x61   : > { %v489_v27 = vld [vmem:[%s1048_s2] ss:$0 sm:$0xff]  ;;  %p713_p12 = scmp.lt.s32.totalorder %s999_s10, %s711_s7  ;;  %p714_p11 = scmp.lt.s32.totalorder %s712_s8, %s706_s26 }
  0x62   : > { %551 = vmatpush3.bf16.msra.mxu0 %v550_v7  ;;  %p709_p8 = pneg %p708_p6 }
  0x63   : > { %552 = vmatprep.subr.bf16.mxu0 %v798_v0  ;;  %p715_p0 = por %p714_p11, %p713_p12 }
  0x65   : > { %p716_p5 = pnand %p715_p0, %p709_p8 }
  0x66   : > { %554 = vmatpush3.bf16.msra.mxu0 %v553_v10 }
  0x67   : > { %555 = vmatprep.subr.bf16.mxu0 %v798_v0 }
  0x6a   : > { %557 = vmatpush3.bf16.msra.mxu0 %v556_v13 }
  0x6b   : > { %558 = vmatprep.subr.bf16.mxu0 %v798_v0 }
  0x6e   : > { %560 = vmatpush3.bf16.msra.mxu0 %v559_v16 }
  0x6f   : > { %561 = vmatprep.subr.bf16.mxu0 %v798_v0 }
  0x72   : > { %563 = vmatpush3.bf16.msra.mxu0 %v562_v19 }
  0x73   : > { %564 = vmatprep.subr.bf16.mxu0 %v798_v0 }
  0x76   : > { %566 = vmatpush3.bf16.msra.mxu0 %v565_v22 }
  0x77   : > { %567 = vmatprep.subr.bf16.mxu0 %v798_v0 }
  0x7a   : > { %569 = vmatpush3.bf16.msra.mxu0 %v568_v25 }
  0x7d   : > { %544 = vmatmul.mubr.f32.vlgmr.msra.gmra.mrb[0].mxu0 %v264_v26 }
 0x150   : > { %v347_v28 = vpop.f32.mrb[0].mxu0 }
 0x151   : > { %v351_v29 = vadd.f32 %v489_v27, %v347_v28  ;;  %v545_v30 = vpop.f32.mrb[1].mxu0 }
 0x153   : > { %352 = vst [vmem:[%s246_s9] sm:$0xff] %v351_v29 }
 0x154   : > { %719 = shalt.err (!%p716_p5)
}
 0x155   : > { %s720_s21 = scalar_lea.hbm %s997_s29, 128  ;;  %s724_s27 = scalar_lea.hbm %s1049_s3, 256 }
 0x156   : > { %p721_p9 = scmp.ne.s32.totalorder %s997_s29, %s720_s21  ;;  %p725_p7 = scmp.lt.u32.totalorder %s997_s29, %s1049_s3 }
 0x157   : > { %p726_p3 = scmp.lt.u32.totalorder %s724_s27, %s720_s21  ;;  %p728_p4 = scmp.lt.u32.totalorder %s720_s21, %s997_s29 }
 0x158   : > { %p722_p1 = pnand %p721_p9, %p918_p10 }
 0x159   : > { %p727_p13 = por %p726_p3, %p725_p7 }
 0x15a   : > { %p723_p2 = pneg %p722_p1 }
 0x15b   : > { %p729_p6 = por %p728_p4, %p727_p13 }
 0x15d   : > { %p730_p8 = pnand %p729_p6, %p723_p2 }
 0x15f   : > { %733 = shalt.err (!%p730_p8)
}
 0x160   : > { %576 = dma.vmem_to_hbm [thread:$0]  (%p918_p10), %s999_s10, 128, %s997_s29, %s354_s6  }
 0x161 PF: > { %s380_s22 = sand.u32 1, %s772_s12   ;;  %p1067_p12 = scmp.ne.s32.totalorder %s1057_s23, 0 }
 0x162   : > { %p1068_p11 = scmp.ge.s32.totalorder %s792_s17, 2  ;;  %s381_s24 = scalar_lea.sflag [#allocation4], %s380_s22 }
 0x164   : > { %p587_p0 = pnand %p1068_p11, %p1067_p12 }
 0x166   : > { %767 = dma.done.wait (!%p587_p0), %s381_s24, 128  }
 0x167   : > { %769 = vsyncadd (!%p587_p0), %s381_s24, 4294967168  ;;  %s20_s17 = sadd.s32 1, %s792_s17   ;;  %s1069_s12 = smov %s776_s13 }
 0x168   : > { %p17_p5 = scmp.ge.s32.totalorder %s20_s17, 4   ;;  %s1070_s13 = smov %s780_s14 }
 0x169   : > { %s1071_s14 = smov %s927_s5  ;;  %s1072_s15 = smov %s788_s16 }
 0x16a   : > { %s1073_s16 = smov %s1075_s28  ;;  %19 = sbr.rel (!%p17_p5) target bundleno = 7 (0x7), region = 89 }
 0x171   :  { %386 = vsyncpa [#allocation3], 1 }
 0x172   :  { %388 = vsyncpa [#allocation3 + $0x1], 1 }
 0x173   :  { %389 = vsyncpa [#allocation6], 1 }
 0x174   :  { %390 = vsyncpa [#allocation4], 1 }
 0x175   :  { %392 = vsyncpa [#allocation4 + $0x1], 1 }

</bundles_post_ra>
